<compile_context>
chip_gen: v6e
topology: v6e:2x2x1
jax: 0.10.0
libtpu: 0.0.40
codegen_flags: <defaults>
</compile_context>

<pallas_src>
import math

import jax
import jax.numpy as jnp
from jax import lax
from jax.experimental import pallas as pl
from jax.experimental.pallas import tpu as pltpu  # noqa: F401  (kept per template)

# ----------------------- config (small, deterministic) -----------------------
B = 2            # batch
SEQ_LEN = 8      # args.seq_len
HIDDEN = 32      # args.hidden_size
MM_DIM = HIDDEN  # args.mm_dim (must equal hidden_size, see tokens_norm usage)
NUM_GROUP = 4    # args.interest_num
ITEM_NUM = 64    # args.item_num
TEXT_DIM = 384   # text_layer input dim


def _layer_norm(x, gamma, beta, eps):
    mu = jnp.mean(x, axis=-1, keepdims=True)
    var = jnp.mean(jnp.square(x - mu), axis=-1, keepdims=True)
    return (x - mu) * lax.rsqrt(var + eps) * gamma + beta


# ------------------------------- Pallas kernel --------------------------------
def mmclus_kernel(item_ref, mcol_ref, mrow_ref, target_ref, txt_ref,
                  gt_ref, emb_t_ref, w_text_ref, b_text_ref, ln_ref,
                  fin_ref, misc_ref):
    Bb, _, S = mrow_ref.shape                    # [B, 1, S]
    _, H = item_ref.shape                        # [B*S, H]
    K = gt_ref.shape[0]

    ln = ln_ref[...]                             # [6, H]
    norm_g, norm_b = ln[0:1], ln[1:2]            # self.norm        (eps 1e-12)
    tok_g, tok_b = ln[2:3], ln[3:4]              # self.tokens_norm (eps 1e-5)
    tgt_g, tgt_b = ln[4:5], ln[5:6]              # self.target_norm (eps 1e-5)

    # item_eb = embeddings(input_ids) * mask ; add_pos_sep == LayerNorm(x + 0)
    x2 = _layer_norm(item_ref[...] * mcol_ref[...], norm_g, norm_b, 1e-12)   # [B*S, H]
    x3 = x2.reshape(Bb, S, H)                                                # sublane split only

    # information_passing with pass_type='no': group_token passes through.
    gt = jnp.broadcast_to(gt_ref[...][None], (Bb, K, H))                     # [B, K, H]

    # assignment (GroupingBlock): masked cross-attention pooling, batched over B.
    scale = jnp.float32(1.0 / math.sqrt(H))
    logits = jnp.einsum('bkh,bsh->bks', gt, x3,
                        preferred_element_type=jnp.float32) * scale          # [B, K, S]
    logits = jnp.where(mrow_ref[...] > 0.0, logits, jnp.float32(-1e30))
    logits = logits - jnp.max(logits, axis=-1, keepdims=True)
    p = jnp.exp(logits)
    attn = p / jnp.sum(p, axis=-1, keepdims=True)                            # softmax over S
    fin_raw = jnp.einsum('bks,bsh->bkh', attn, x3,
                         preferred_element_type=jnp.float32)                 # [B, K, H]

    # fin_group = tokens_norm(fin_group)
    fin_group = _layer_norm(fin_raw, tok_g, tok_b, 1e-5)
    fin_ref[...] = fin_group

    # unit_vector_id: AdaptiveAvgPool1d(1) over group tokens + Identity head.
    id_vec = jnp.mean(fin_group, axis=1, keepdims=True)                      # [B, 1, H]

    # target_eb = target_norm(embeddings(target_item))
    target = _layer_norm(target_ref[...], tgt_g, tgt_b, 1e-5)                # [B, 1, H]

    # read_out (soft): pure VPU broadcast-multiply + reduce (no MXU micro-matmul).
    att = jnp.sum(fin_group * target, axis=-1, keepdims=True)                # [B, K, 1]
    att = att - jnp.max(att, axis=1, keepdims=True)
    att = jnp.exp(att)
    att = att / jnp.sum(att, axis=1, keepdims=True)                          # softmax over K
    readout = jnp.sum(att * fin_group, axis=1, keepdims=True)                # [B, 1, H]

    # calculate_score: one MXU push for the whole batch against the
    # pre-transposed embedding table [H, N].
    scores = jnp.dot(readout, emb_t_ref[...],
                     preferred_element_type=jnp.float32)                     # [B, 1, N]

    # non_invasive (direct=True, modality='text'): one batched [B*S,384]@[384,H]
    # matmul, tokens_norm, then per-sequence mean (+ Identity head).
    proj = jnp.dot(txt_ref[...], w_text_ref[...],
                   preferred_element_type=jnp.float32) + b_text_ref[...]     # [B*S, H]
    proj = _layer_norm(proj, tok_g, tok_b, 1e-5)
    mm_vec = jnp.mean(proj.reshape(Bb, S, H), axis=1, keepdims=True)         # [B, 1, H]

    # Pack scores | id | mm into one lane-dense slab (N + 2H = 128 lanes).
    misc_ref[...] = jnp.concatenate([scores, id_vec, mm_vec], axis=-1)       # [B, 1, N+2H]


# --------------------------------- wrapper -------------------------------------
def mmclus_forward(input_ids, target_item, image_ids, txt_ids, mask, params):
    del image_ids  # modality='text', direct=True: image branch unused
    emb = params['embeddings']                                   # [N, H]
    Bb, S = input_ids.shape
    N, H = emb.shape
    K = params['group_token'].shape[0]
    T = txt_ids.shape[-1]

    # Layout plumbing (gathers + lane-friendly reshapes) stays in the wrapper.
    item2d = jnp.take(emb, input_ids.reshape(-1), axis=0)        # [B*S, H]
    target3 = jnp.take(emb, target_item, axis=0)[:, None, :]     # [B, 1, H]
    mask_f = mask.astype(jnp.float32)
    mask_col = mask_f.reshape(-1, 1)                             # [B*S, 1]
    mask_row = mask_f[:, None, :]                                # [B, 1, S]
    txt2d = txt_ids.reshape(Bb * S, T)                           # [B*S, T]
    emb_t = emb.T                                                # [H, N]
    ln_params = jnp.stack([params['norm_g'], params['norm_b'],
                           params['tokens_g'], params['tokens_b'],
                           params['target_g'], params['target_b']], axis=0)  # [6, H]
    b_text = params['b_text'][None, :]                           # [1, H]

    out_shapes = (
        jax.ShapeDtypeStruct((Bb, K, H), jnp.float32),           # fin_group
        jax.ShapeDtypeStruct((Bb, 1, N + 2 * H), jnp.float32),   # scores|id|mm packed
    )

    # Single invocation (no grid): whole batch, all operands resident in VMEM
    # (~90 KiB working set), shared weights DMA'd once.
    fin_group, misc = pl.pallas_call(
        mmclus_kernel,
        out_shape=out_shapes,
    )(item2d, mask_col, mask_row, target3, txt2d,
      params['group_token'], emb_t, params['w_text'], b_text, ln_params)

    misc2 = misc[:, 0, :]
    scores = misc2[:, :N]
    id_vec = misc2[:, N:N + H]
    mm_vec = misc2[:, N + H:]
    return fin_group, scores, id_vec, mm_vec


# ---------------------------- pure-JAX reference --------------------------------
def mmclus_reference(input_ids, target_item, txt_ids, mask, params):
    emb = params['embeddings']
    mask_f = mask.astype(jnp.float32)
    item_eb = jnp.take(emb, input_ids, axis=0) * mask_f[:, :, None]
    x = _layer_norm(item_eb, params['norm_g'], params['norm_b'], 1e-12)
    gt = jnp.broadcast_to(params['group_token'][None], (x.shape[0], NUM_GROUP, HIDDEN))
    logits = jnp.einsum('bkh,bsh->bks', gt, x) / math.sqrt(HIDDEN)
    logits = jnp.where(mask_f[:, None, :] > 0.0, logits, -1e30)
    attn = jax.nn.softmax(logits, axis=-1)
    fin_raw = jnp.einsum('bks,bsh->bkh', attn, x)
    fin_group = _layer_norm(fin_raw, params['tokens_g'], params['tokens_b'], 1e-5)
    id_vec = jnp.mean(fin_group, axis=1)
    target = _layer_norm(jnp.take(emb, target_item, axis=0),
                         params['target_g'], params['target_b'], 1e-5)
    att = jax.nn.softmax(jnp.einsum('bkh,bh->bk', fin_group, target), axis=-1)
    readout = jnp.einsum('bk,bkh->bh', att, fin_group)
    scores = readout @ emb.T
    proj = txt_ids @ params['w_text'] + params['b_text'][None, None, :]
    proj = _layer_norm(proj, params['tokens_g'], params['tokens_b'], 1e-5)
    mm_vec = jnp.mean(proj, axis=1)
    return fin_group, scores, id_vec, mm_vec


# ------------------------------------ main ---------------------------------------
if __name__ == "__main__":
    key = jax.random.PRNGKey(0)
    k_emb, k_gt, k_wt, k_ids, k_tgt, k_txt, k_img = jax.random.split(key, 7)

    # Deterministic parameter init (std=0.02 normal, padding_idx=0 row zeroed,
    # trunc_normal-style init for group_token, LayerNorms at identity).
    embeddings = 0.02 * jax.random.normal(k_emb, (ITEM_NUM, HIDDEN), jnp.float32)
    embeddings = embeddings.at[0].set(0.0)
    params = dict(
        embeddings=embeddings,
        group_token=0.02 * jax.random.normal(k_gt, (NUM_GROUP, HIDDEN), jnp.float32),
        w_text=0.02 * jax.random.normal(k_wt, (TEXT_DIM, HIDDEN), jnp.float32),
        b_text=jnp.zeros((HIDDEN,), jnp.float32),
        norm_g=jnp.ones((HIDDEN,), jnp.float32), norm_b=jnp.zeros((HIDDEN,), jnp.float32),
        tokens_g=jnp.ones((HIDDEN,), jnp.float32), tokens_b=jnp.zeros((HIDDEN,), jnp.float32),
        target_g=jnp.ones((HIDDEN,), jnp.float32), target_b=jnp.zeros((HIDDEN,), jnp.float32),
    )

    # Deterministic example inputs.
    lengths = jnp.array([SEQ_LEN, 5], dtype=jnp.int32)
    mask = (jnp.arange(SEQ_LEN)[None, :] < lengths[:, None]).astype(jnp.float32)  # [B, S]
    input_ids = jax.random.randint(k_ids, (B, SEQ_LEN), 1, ITEM_NUM)
    input_ids = (input_ids * mask.astype(jnp.int32))                               # pad -> id 0
    target_item = jax.random.randint(k_tgt, (B,), 1, ITEM_NUM)
    txt_ids = jax.random.normal(k_txt, (B, SEQ_LEN, TEXT_DIM), jnp.float32)
    image_ids = jax.random.normal(k_img, (B, SEQ_LEN, 16), jnp.float32)            # unused (text modality)

    fin_group, scores, id_vector, mm_vector = jax.block_until_ready(
        mmclus_forward(input_ids, target_item, image_ids, txt_ids, mask, params))

    # Correctness check against a pure-JAX reference of the same math.
    ref = mmclus_reference(input_ids, target_item, txt_ids, mask, params)
    for got, exp, name in zip((fin_group, scores, id_vector, mm_vector), ref,
                              ("fin_group", "scores", "id_vector", "mm_vector")):
        err = float(jnp.max(jnp.abs(got - exp)))
        assert err < 1e-2, f"{name} mismatch: max abs err {err}"
        assert bool(jnp.all(jnp.isfinite(got))), f"{name} has non-finite values"

    assert fin_group.shape == (B, NUM_GROUP, HIDDEN)
    assert scores.shape == (B, ITEM_NUM)
    assert id_vector.shape == (B, HIDDEN)
    assert mm_vector.shape == (B, MM_DIM)
    print("KERNEL_OK")
</pallas_src>

<mosaic_0001>
module attributes {stable_mosaic.version = 11 : i64} {
  func.func @mmclus_kernel(%arg0: memref<16x32xf32, #tpu.memory_space<vmem>>, %arg1: memref<16x1xf32, #tpu.memory_space<vmem>>, %arg2: memref<2x1x8xf32, #tpu.memory_space<vmem>>, %arg3: memref<2x1x32xf32, #tpu.memory_space<vmem>>, %arg4: memref<16x384xf32, #tpu.memory_space<vmem>>, %arg5: memref<4x32xf32, #tpu.memory_space<vmem>>, %arg6: memref<32x64xf32, #tpu.memory_space<vmem>>, %arg7: memref<384x32xf32, #tpu.memory_space<vmem>>, %arg8: memref<1x32xf32, #tpu.memory_space<vmem>>, %arg9: memref<6x32xf32, #tpu.memory_space<vmem>>, %arg10: memref<2x4x32xf32, #tpu.memory_space<vmem>>, %arg11: memref<2x1x128xf32, #tpu.memory_space<vmem>>) attributes {dimension_semantics = [], scalar_prefetch = 0 : i64, scratch_operands = 0 : i64, tpu.core_type = #tpu.core_type<tc>} {
    %c0 = arith.constant 0 : index
    %c0_0 = arith.constant 0 : index
    %0 = vector.load %arg9[%c0, %c0_0] : memref<6x32xf32, #tpu.memory_space<vmem>>, vector<6x32xf32>
    %1 = vector.extract_strided_slice %0 {offsets = [0, 0], sizes = [1, 32], strides = [1, 1]} : vector<6x32xf32> to vector<1x32xf32>
    %2 = vector.extract_strided_slice %0 {offsets = [1, 0], sizes = [1, 32], strides = [1, 1]} : vector<6x32xf32> to vector<1x32xf32>
    %3 = vector.extract_strided_slice %0 {offsets = [2, 0], sizes = [1, 32], strides = [1, 1]} : vector<6x32xf32> to vector<1x32xf32>
    %4 = vector.extract_strided_slice %0 {offsets = [3, 0], sizes = [1, 32], strides = [1, 1]} : vector<6x32xf32> to vector<1x32xf32>
    %5 = vector.extract_strided_slice %0 {offsets = [4, 0], sizes = [1, 32], strides = [1, 1]} : vector<6x32xf32> to vector<1x32xf32>
    %6 = vector.extract_strided_slice %0 {offsets = [5, 0], sizes = [1, 32], strides = [1, 1]} : vector<6x32xf32> to vector<1x32xf32>
    %c0_1 = arith.constant 0 : index
    %c0_2 = arith.constant 0 : index
    %7 = vector.load %arg0[%c0_1, %c0_2] : memref<16x32xf32, #tpu.memory_space<vmem>>, vector<16x32xf32>
    %c0_3 = arith.constant 0 : index
    %c0_4 = arith.constant 0 : index
    %8 = vector.load %arg1[%c0_3, %c0_4] : memref<16x1xf32, #tpu.memory_space<vmem>>, vector<16x1xf32>
    %9 = vector.broadcast %8 : vector<16x1xf32> to vector<16x32xf32>
    %10 = arith.mulf %7, %9 : vector<16x32xf32>
    %cst = arith.constant dense<0.000000e+00> : vector<16xf32>
    %11 = vector.multi_reduction <add>, %10, %cst [1] : vector<16x32xf32> to vector<16xf32>
    %12 = vector.shape_cast %11 : vector<16xf32> to vector<16x1xf32>
    %cst_5 = arith.constant 3.200000e+01 : f32
    %13 = vector.broadcast %cst_5 : f32 to vector<16x1xf32>
    %14 = arith.divf %12, %13 : vector<16x1xf32>
    %15 = vector.broadcast %14 : vector<16x1xf32> to vector<16x32xf32>
    %16 = arith.subf %10, %15 : vector<16x32xf32>
    %17 = arith.mulf %16, %16 : vector<16x32xf32>
    %cst_6 = arith.constant dense<0.000000e+00> : vector<16xf32>
    %18 = vector.multi_reduction <add>, %17, %cst_6 [1] : vector<16x32xf32> to vector<16xf32>
    %19 = vector.shape_cast %18 : vector<16xf32> to vector<16x1xf32>
    %cst_7 = arith.constant 3.200000e+01 : f32
    %20 = vector.broadcast %cst_7 : f32 to vector<16x1xf32>
    %21 = arith.divf %19, %20 : vector<16x1xf32>
    %22 = vector.broadcast %14 : vector<16x1xf32> to vector<16x32xf32>
    %23 = arith.subf %10, %22 : vector<16x32xf32>
    %cst_8 = arith.constant 9.99999996E-13 : f32
    %24 = vector.broadcast %cst_8 : f32 to vector<16x1xf32>
    %25 = arith.addf %21, %24 : vector<16x1xf32>
    %26 = math.rsqrt %25 : vector<16x1xf32>
    %27 = vector.broadcast %26 : vector<16x1xf32> to vector<16x32xf32>
    %28 = arith.mulf %23, %27 : vector<16x32xf32>
    %29 = vector.broadcast %1 : vector<1x32xf32> to vector<16x32xf32>
    %30 = arith.mulf %28, %29 : vector<16x32xf32>
    %31 = vector.broadcast %2 : vector<1x32xf32> to vector<16x32xf32>
    %32 = arith.addf %30, %31 : vector<16x32xf32>
    %33 = vector.shape_cast %32 : vector<16x32xf32> to vector<2x8x32xf32>
    %c0_9 = arith.constant 0 : index
    %c0_10 = arith.constant 0 : index
    %34 = vector.load %arg5[%c0_9, %c0_10] : memref<4x32xf32, #tpu.memory_space<vmem>>, vector<4x32xf32>
    %35 = vector.shape_cast %34 : vector<4x32xf32> to vector<1x4x32xf32>
    %36 = vector.shape_cast %35 : vector<1x4x32xf32> to vector<1x4x32xf32>
    %37 = vector.broadcast %36 : vector<1x4x32xf32> to vector<2x4x32xf32>
    "tpu.trace_start"() <{level = 10 : i32, message = "bkh,bsh->bks"}> : () -> ()
    %cst_11 = arith.constant dense<0.000000e+00> : vector<2x4x8xf32>
    %38 = tpu.matmul %37, %33, %cst_11 {dimension_numbers = #tpu.dot_dimension_numbers<[2], [2], [1], [1], [0, 0, 0, 1, 1, 1], [0], [0]>} : vector<2x4x32xf32>, vector<2x8x32xf32>, vector<2x4x8xf32> -> vector<2x4x8xf32>
    "tpu.trace_stop"() : () -> ()
    %cst_12 = arith.constant 0.176776692 : f32
    %39 = vector.broadcast %cst_12 : f32 to vector<2x4x8xf32>
    %40 = arith.mulf %38, %39 : vector<2x4x8xf32>
    %c0_13 = arith.constant 0 : index
    %c0_14 = arith.constant 0 : index
    %c0_15 = arith.constant 0 : index
    %41 = vector.load %arg2[%c0_13, %c0_14, %c0_15] : memref<2x1x8xf32, #tpu.memory_space<vmem>>, vector<2x1x8xf32>
    %cst_16 = arith.constant 0.000000e+00 : f32
    %42 = vector.broadcast %cst_16 : f32 to vector<2x1x8xf32>
    %43 = arith.cmpf ogt, %41, %42 : vector<2x1x8xf32>
    %cst_17 = arith.constant -1.000000e+30 : f32
    %44 = vector.shape_cast %43 : vector<2x1x8xi1> to vector<2x1x8xi1>
    %45 = vector.broadcast %44 : vector<2x1x8xi1> to vector<2x4x8xi1>
    %46 = vector.broadcast %cst_17 : f32 to vector<2x4x8xf32>
    %47 = arith.select %45, %40, %46 : vector<2x4x8xi1>, vector<2x4x8xf32>
    %cst_18 = arith.constant dense<0xFF800000> : vector<2x4xf32>
    %48 = vector.multi_reduction <maximumf>, %47, %cst_18 [2] : vector<2x4x8xf32> to vector<2x4xf32>
    %49 = vector.shape_cast %48 : vector<2x4xf32> to vector<2x4x1xf32>
    %50 = vector.broadcast %49 : vector<2x4x1xf32> to vector<2x4x8xf32>
    %51 = arith.subf %47, %50 : vector<2x4x8xf32>
    %52 = math.exp %51 : vector<2x4x8xf32>
    %cst_19 = arith.constant dense<0.000000e+00> : vector<2x4xf32>
    %53 = vector.multi_reduction <add>, %52, %cst_19 [2] : vector<2x4x8xf32> to vector<2x4xf32>
    %54 = vector.shape_cast %53 : vector<2x4xf32> to vector<2x4x1xf32>
    %55 = vector.broadcast %54 : vector<2x4x1xf32> to vector<2x4x8xf32>
    %56 = arith.divf %52, %55 : vector<2x4x8xf32>
    "tpu.trace_start"() <{level = 10 : i32, message = "bks,bsh->bkh"}> : () -> ()
    %cst_20 = arith.constant dense<0.000000e+00> : vector<2x4x32xf32>
    %57 = tpu.matmul %56, %33, %cst_20 {dimension_numbers = #tpu.dot_dimension_numbers<[2], [1], [1], [2], [0, 0, 0, 1, 1, 2], [0], [0]>} : vector<2x4x8xf32>, vector<2x8x32xf32>, vector<2x4x32xf32> -> vector<2x4x32xf32>
    "tpu.trace_stop"() : () -> ()
    %cst_21 = arith.constant dense<0.000000e+00> : vector<2x4xf32>
    %58 = vector.multi_reduction <add>, %57, %cst_21 [2] : vector<2x4x32xf32> to vector<2x4xf32>
    %59 = vector.shape_cast %58 : vector<2x4xf32> to vector<2x4x1xf32>
    %cst_22 = arith.constant 3.200000e+01 : f32
    %60 = vector.broadcast %cst_22 : f32 to vector<2x4x1xf32>
    %61 = arith.divf %59, %60 : vector<2x4x1xf32>
    %62 = vector.broadcast %61 : vector<2x4x1xf32> to vector<2x4x32xf32>
    %63 = arith.subf %57, %62 : vector<2x4x32xf32>
    %64 = arith.mulf %63, %63 : vector<2x4x32xf32>
    %cst_23 = arith.constant dense<0.000000e+00> : vector<2x4xf32>
    %65 = vector.multi_reduction <add>, %64, %cst_23 [2] : vector<2x4x32xf32> to vector<2x4xf32>
    %66 = vector.shape_cast %65 : vector<2x4xf32> to vector<2x4x1xf32>
    %cst_24 = arith.constant 3.200000e+01 : f32
    %67 = vector.broadcast %cst_24 : f32 to vector<2x4x1xf32>
    %68 = arith.divf %66, %67 : vector<2x4x1xf32>
    %69 = vector.broadcast %61 : vector<2x4x1xf32> to vector<2x4x32xf32>
    %70 = arith.subf %57, %69 : vector<2x4x32xf32>
    %cst_25 = arith.constant 9.99999974E-6 : f32
    %71 = vector.broadcast %cst_25 : f32 to vector<2x4x1xf32>
    %72 = arith.addf %68, %71 : vector<2x4x1xf32>
    %73 = math.rsqrt %72 : vector<2x4x1xf32>
    %74 = vector.broadcast %73 : vector<2x4x1xf32> to vector<2x4x32xf32>
    %75 = arith.mulf %70, %74 : vector<2x4x32xf32>
    %76 = vector.shape_cast %3 : vector<1x32xf32> to vector<1x1x32xf32>
    %77 = vector.broadcast %76 : vector<1x1x32xf32> to vector<2x4x32xf32>
    %78 = arith.mulf %75, %77 : vector<2x4x32xf32>
    %79 = vector.shape_cast %4 : vector<1x32xf32> to vector<1x1x32xf32>
    %80 = vector.broadcast %79 : vector<1x1x32xf32> to vector<2x4x32xf32>
    %81 = arith.addf %78, %80 : vector<2x4x32xf32>
    %c0_26 = arith.constant 0 : index
    %c0_27 = arith.constant 0 : index
    %c0_28 = arith.constant 0 : index
    %82 = vector.load %arg10[%c0_26, %c0_27, %c0_28] : memref<2x4x32xf32, #tpu.memory_space<vmem>>, vector<2x4x32xf32>
    tpu.vector_store %arg10[%c0_26, %c0_27, %c0_28], %81 {strides = array<i32>} : memref<2x4x32xf32, #tpu.memory_space<vmem>>, vector<2x4x32xf32>,
    %cst_29 = arith.constant dense<0.000000e+00> : vector<2x32xf32>
    %83 = vector.multi_reduction <add>, %81, %cst_29 [1] : vector<2x4x32xf32> to vector<2x32xf32>
    %84 = vector.shape_cast %83 : vector<2x32xf32> to vector<2x1x32xf32>
    %cst_30 = arith.constant 4.000000e+00 : f32
    %85 = vector.broadcast %cst_30 : f32 to vector<2x1x32xf32>
    %86 = arith.divf %84, %85 : vector<2x1x32xf32>
    %c0_31 = arith.constant 0 : index
    %c0_32 = arith.constant 0 : index
    %c0_33 = arith.constant 0 : index
    %87 = vector.load %arg3[%c0_31, %c0_32, %c0_33] : memref<2x1x32xf32, #tpu.memory_space<vmem>>, vector<2x1x32xf32>
    %cst_34 = arith.constant dense<0.000000e+00> : vector<2x1xf32>
    %88 = vector.multi_reduction <add>, %87, %cst_34 [2] : vector<2x1x32xf32> to vector<2x1xf32>
    %89 = vector.shape_cast %88 : vector<2x1xf32> to vector<2x1x1xf32>
    %cst_35 = arith.constant 3.200000e+01 : f32
    %90 = vector.broadcast %cst_35 : f32 to vector<2x1x1xf32>
    %91 = arith.divf %89, %90 : vector<2x1x1xf32>
    %92 = vector.broadcast %91 : vector<2x1x1xf32> to vector<2x1x32xf32>
    %93 = arith.subf %87, %92 : vector<2x1x32xf32>
    %94 = arith.mulf %93, %93 : vector<2x1x32xf32>
    %cst_36 = arith.constant dense<0.000000e+00> : vector<2x1xf32>
    %95 = vector.multi_reduction <add>, %94, %cst_36 [2] : vector<2x1x32xf32> to vector<2x1xf32>
    %96 = vector.shape_cast %95 : vector<2x1xf32> to vector<2x1x1xf32>
    %cst_37 = arith.constant 3.200000e+01 : f32
    %97 = vector.broadcast %cst_37 : f32 to vector<2x1x1xf32>
    %98 = arith.divf %96, %97 : vector<2x1x1xf32>
    %99 = vector.broadcast %91 : vector<2x1x1xf32> to vector<2x1x32xf32>
    %100 = arith.subf %87, %99 : vector<2x1x32xf32>
    %cst_38 = arith.constant 9.99999974E-6 : f32
    %101 = vector.broadcast %cst_38 : f32 to vector<2x1x1xf32>
    %102 = arith.addf %98, %101 : vector<2x1x1xf32>
    %103 = math.rsqrt %102 : vector<2x1x1xf32>
    %104 = vector.broadcast %103 : vector<2x1x1xf32> to vector<2x1x32xf32>
    %105 = arith.mulf %100, %104 : vector<2x1x32xf32>
    %106 = vector.shape_cast %5 : vector<1x32xf32> to vector<1x1x32xf32>
    %107 = vector.broadcast %106 : vector<1x1x32xf32> to vector<2x1x32xf32>
    %108 = arith.mulf %105, %107 : vector<2x1x32xf32>
    %109 = vector.shape_cast %6 : vector<1x32xf32> to vector<1x1x32xf32>
    %110 = vector.broadcast %109 : vector<1x1x32xf32> to vector<2x1x32xf32>
    %111 = arith.addf %108, %110 : vector<2x1x32xf32>
    %112 = vector.broadcast %111 : vector<2x1x32xf32> to vector<2x4x32xf32>
    %113 = arith.mulf %81, %112 : vector<2x4x32xf32>
    %cst_39 = arith.constant dense<0.000000e+00> : vector<2x4xf32>
    %114 = vector.multi_reduction <add>, %113, %cst_39 [2] : vector<2x4x32xf32> to vector<2x4xf32>
    %115 = vector.shape_cast %114 : vector<2x4xf32> to vector<2x4x1xf32>
    %cst_40 = arith.constant dense<0xFF800000> : vector<2x1xf32>
    %116 = vector.multi_reduction <maximumf>, %115, %cst_40 [1] : vector<2x4x1xf32> to vector<2x1xf32>
    %117 = vector.shape_cast %116 : vector<2x1xf32> to vector<2x1x1xf32>
    %118 = vector.broadcast %117 : vector<2x1x1xf32> to vector<2x4x1xf32>
    %119 = arith.subf %115, %118 : vector<2x4x1xf32>
    %120 = math.exp %119 : vector<2x4x1xf32>
    %cst_41 = arith.constant dense<0.000000e+00> : vector<2x1xf32>
    %121 = vector.multi_reduction <add>, %120, %cst_41 [1] : vector<2x4x1xf32> to vector<2x1xf32>
    %122 = vector.shape_cast %121 : vector<2x1xf32> to vector<2x1x1xf32>
    %123 = vector.broadcast %122 : vector<2x1x1xf32> to vector<2x4x1xf32>
    %124 = arith.divf %120, %123 : vector<2x4x1xf32>
    %125 = vector.broadcast %124 : vector<2x4x1xf32> to vector<2x4x32xf32>
    %126 = arith.mulf %125, %81 : vector<2x4x32xf32>
    %cst_42 = arith.constant dense<0.000000e+00> : vector<2x32xf32>
    %127 = vector.multi_reduction <add>, %126, %cst_42 [1] : vector<2x4x32xf32> to vector<2x32xf32>
    %128 = vector.shape_cast %127 : vector<2x32xf32> to vector<2x1x32xf32>
    %c0_43 = arith.constant 0 : index
    %c0_44 = arith.constant 0 : index
    %129 = vector.load %arg6[%c0_43, %c0_44] : memref<32x64xf32, #tpu.memory_space<vmem>>, vector<32x64xf32>
    %cst_45 = arith.constant dense<0.000000e+00> : vector<2x1x64xf32>
    %130 = tpu.matmul %128, %129, %cst_45 {dimension_numbers = #tpu.dot_dimension_numbers<[2], [0], [0, 1], [1], [0, 0, 0, 1, 1, 1], [], []>} : vector<2x1x32xf32>, vector<32x64xf32>, vector<2x1x64xf32> -> vector<2x1x64xf32>
    %c0_46 = arith.constant 0 : index
    %c0_47 = arith.constant 0 : index
    %131 = vector.load %arg4[%c0_46, %c0_47] : memref<16x384xf32, #tpu.memory_space<vmem>>, vector<16x384xf32>
    %c0_48 = arith.constant 0 : index
    %c0_49 = arith.constant 0 : index
    %132 = vector.load %arg7[%c0_48, %c0_49] : memref<384x32xf32, #tpu.memory_space<vmem>>, vector<384x32xf32>
    %cst_50 = arith.constant dense<0.000000e+00> : vector<16x32xf32>
    %133 = tpu.matmul %131, %132, %cst_50 {dimension_numbers = #tpu.dot_dimension_numbers<[1], [0], [0], [1], [0, 0, 1, 1], [], []>} : vector<16x384xf32>, vector<384x32xf32>, vector<16x32xf32> -> vector<16x32xf32>
    %c0_51 = arith.constant 0 : index
    %c0_52 = arith.constant 0 : index
    %134 = vector.load %arg8[%c0_51, %c0_52] : memref<1x32xf32, #tpu.memory_space<vmem>>, vector<1x32xf32>
    %135 = vector.broadcast %134 : vector<1x32xf32> to vector<16x32xf32>
    %136 = arith.addf %133, %135 : vector<16x32xf32>
    %cst_53 = arith.constant dense<0.000000e+00> : vector<16xf32>
    %137 = vector.multi_reduction <add>, %136, %cst_53 [1] : vector<16x32xf32> to vector<16xf32>
    %138 = vector.shape_cast %137 : vector<16xf32> to vector<16x1xf32>
    %cst_54 = arith.constant 3.200000e+01 : f32
    %139 = vector.broadcast %cst_54 : f32 to vector<16x1xf32>
    %140 = arith.divf %138, %139 : vector<16x1xf32>
    %141 = vector.broadcast %140 : vector<16x1xf32> to vector<16x32xf32>
    %142 = arith.subf %136, %141 : vector<16x32xf32>
    %143 = arith.mulf %142, %142 : vector<16x32xf32>
    %cst_55 = arith.constant dense<0.000000e+00> : vector<16xf32>
    %144 = vector.multi_reduction <add>, %143, %cst_55 [1] : vector<16x32xf32> to vector<16xf32>
    %145 = vector.shape_cast %144 : vector<16xf32> to vector<16x1xf32>
    %cst_56 = arith.constant 3.200000e+01 : f32
    %146 = vector.broadcast %cst_56 : f32 to vector<16x1xf32>
    %147 = arith.divf %145, %146 : vector<16x1xf32>
    %148 = vector.broadcast %140 : vector<16x1xf32> to vector<16x32xf32>
    %149 = arith.subf %136, %148 : vector<16x32xf32>
    %cst_57 = arith.constant 9.99999974E-6 : f32
    %150 = vector.broadcast %cst_57 : f32 to vector<16x1xf32>
    %151 = arith.addf %147, %150 : vector<16x1xf32>
    %152 = math.rsqrt %151 : vector<16x1xf32>
    %153 = vector.broadcast %152 : vector<16x1xf32> to vector<16x32xf32>
    %154 = arith.mulf %149, %153 : vector<16x32xf32>
    %155 = vector.broadcast %3 : vector<1x32xf32> to vector<16x32xf32>
    %156 = arith.mulf %154, %155 : vector<16x32xf32>
    %157 = vector.broadcast %4 : vector<1x32xf32> to vector<16x32xf32>
    %158 = arith.addf %156, %157 : vector<16x32xf32>
    %159 = vector.shape_cast %158 : vector<16x32xf32> to vector<2x8x32xf32>
    %cst_58 = arith.constant dense<0.000000e+00> : vector<2x32xf32>
    %160 = vector.multi_reduction <add>, %159, %cst_58 [1] : vector<2x8x32xf32> to vector<2x32xf32>
    %161 = vector.shape_cast %160 : vector<2x32xf32> to vector<2x1x32xf32>
    %cst_59 = arith.constant 8.000000e+00 : f32
    %162 = vector.broadcast %cst_59 : f32 to vector<2x1x32xf32>
    %163 = arith.divf %161, %162 : vector<2x1x32xf32>
    %164 = tpu.concatenate %130, %86, %163 in 2 : vector<2x1x64xf32>, vector<2x1x32xf32>, vector<2x1x32xf32> -> vector<2x1x128xf32>
    %c0_60 = arith.constant 0 : index
    %c0_61 = arith.constant 0 : index
    %c0_62 = arith.constant 0 : index
    %165 = vector.load %arg11[%c0_60, %c0_61, %c0_62] : memref<2x1x128xf32, #tpu.memory_space<vmem>>, vector<2x1x128xf32>
    tpu.vector_store %arg11[%c0_60, %c0_61, %c0_62], %164 {strides = array<i32>} : memref<2x1x128xf32, #tpu.memory_space<vmem>>, vector<2x1x128xf32>,
    return
  }
}

</mosaic_0001>

<bundles_post_ra>
// kernel: tpu_custom_call.1
= control target key start
LH: loop header
LB: loop body
LE: loop exit
PB: predicated region body
PF: predicated region fallthrough
CT: control target
= control target key end

     0   :  { %17 = vsyncpa [#allocation3], 0  ;;  %v1279_v1 = vmov 0   ;;  %s1688_s0 = inlined_call_operand.vmem [shape: f32[16,32], index: 0, kind: input, shape index: {}]   ;;  %s1689_s1 = inlined_call_operand.vmem [shape: f32[16,1], index: 1, kind: input, shape index: {}]   ;;  %s1690_s2 = inlined_call_operand.vmem [shape: f32[2,1,8], index: 2, kind: input, shape index: {}]   ;;  %s1691_s3 = inlined_call_operand.vmem [shape: f32[2,1,32], index: 3, kind: input, shape index: {}]   ;;  %s1692_s4 = inlined_call_operand.vmem [shape: f32[16,384], index: 4, kind: input, shape index: {}]   ;;  %s1693_s5 = inlined_call_operand.vmem [shape: f32[4,32], index: 5, kind: input, shape index: {}]   ;;  %s1694_s6 = inlined_call_operand.vmem [shape: f32[32,64], index: 6, kind: input, shape index: {}]   ;;  %s1695_s7 = inlined_call_operand.vmem [shape: f32[384,32], index: 7, kind: input, shape index: {}]   ;;  %s1696_s8 = inlined_call_operand.vmem [shape: f32[1,32], index: 8, kind: input, shape index: {}]   ;;  %s1697_s9 = inlined_call_operand.vmem [shape: f32[6,32], index: 9, kind: input, shape index: {}]   ;;  %s1698_s10 = inlined_call_operand.hbm [shape: f32[2,4,32], index: 10, kind: output, shape index: {0}]   ;;  %s1699_s11 = inlined_call_operand.hbm [shape: f32[2,1,128], index: 11, kind: output, shape index: {1}]  }
   0x1   :  { %v42_v0 = vld [vmem:[%s1689_s1] sm:$0xff]  ;;  %1201 = vset.pattern.permute.xlu0 %v1279_v1 }
   0x2   :  { %18 = vsyncpa [#allocation5], 0  ;;  %46 = vperm.xlu0 %1201, %v42_v0   ;;  %v43_v2 = vld [vmem:[%s1689_s1 + $0x8] sm:$0xff]  ;;  %v40_v3 = vld [vmem:[%s1688_s0] sm:$0xff]  ;;  %vm56_vm0 = vcmask 261120   ;;  %v1280_v21 = vmov 0.0   ;;  %v84_v27 = vlaneseq }
   0x3   :  { %v41_v6 = vld [vmem:[%s1688_s0 + $0x8] sm:$0xff]  ;;  %1124 = vmatprep.subr.mxu0 %v1280_v21  ;;  %1129 = vmatprep.subr.mxu1 %v1280_v21  ;;  %vm1281_vm1 = vmmov 0   ;;  %v1381_v31 = vld [vmem:[%s1697_s9] sm:$0x3f]  ;;  %vm266_vm5 = vcmask 60416   ;;  %vm496_vm7 = vcmask 253952  }
   0x4   :  { %1126 = vmatprep.mubr.msk.f32.mxu0 %vm1281_vm1, %v1280_v21  ;;  %1131 = vmatprep.mubr.msk.f32.mxu1 %vm1281_vm1, %v1280_v21  ;;  %v1373_v29 = vshrl.u32 %v84_v27, 7  ;;  %v96_v41 = vld [vmem:[%s1693_s5] sm:$0xf]  ;;  %vm289_vm8 = vcmask 64512   ;;  %vm436_vm9 = vcmask 257024   ;;  %vm573_vm10 = vcmask 1043456  }
   0x5   :  { %v248_v44 = vld [vmem:[%s1690_s2] sm:$0x1]  ;;  %v249_v45 = vld [vmem:[%s1690_s2 + $0x1] sm:$0x1]  ;;  %vm634_vm11 = vcmask 1041409  }
   0x6   :  { %51 = vperm.xlu0 %1201, %v43_v2   ;;  %v1376_v30 = vsub.s32 0, %v1373_v29  ;;  %v92_v32 = vsub.s32 1, %v1373_v29  ;;  %vm250_vm2 = vcmp.gt.f32.partialorder %v248_v44, 0.0  ;;  %vm251_vm3 = vcmp.gt.f32.partialorder %v249_v45, 0.0 }
   0x7   :  { %v252_v46 = vsel %vm250_vm2, 1, %v1279_v1  ;;  %v253_v48 = vsel %vm251_vm3, 1, %v1279_v1 }
   0x8   :  { %v87_v33 = vrot.slane %v1381_v31, %v1376_v30  ;;  %v93_v36 = vrot.slane %v1381_v31, %v92_v32  ;;  %v257_v47 = vrot.slane %v252_v46, %v1376_v30  ;;  %v261_v50 = vrot.slane %v253_v48, %v1376_v30 }
   0xa   :  { %vm262_vm4 = vcmp.eq.s32.totalorder %v257_v47, 1  ;;  %vm263_vm6 = vcmp.eq.s32.totalorder %v261_v50, 1 }
  0x7d   :  { %v47_v4 = vpop.permute.xlu0 %46 }
  0x7e   :  { %v54_v5 = vmul.f32 %v47_v4, %v40_v3 }
  0x80   :  { %v57_v7 = vsel %vm56_vm0, %v54_v5, 0.0 }
  0x81   :  { %v52_v8 = vpop.permute.xlu0 %51  ;;  %58 = vadd.xlane.f32.xlu1 %v57_v7  ;;  %v495_v7 = vld [vmem:[%s1691_s3 + $0x1] sm:$0x1] }
  0x82   :  { %v55_v9 = vmul.f32 %v52_v8, %v41_v6  ;;  %v494_v6 = vld [vmem:[%s1691_s3] sm:$0x1] }
  0x83   :  { %v497_v8 = vsel %vm496_vm7, %v494_v6, 0.0 }
  0x84   :  { %v60_v10 = vsel %vm56_vm0, %v55_v9, 0.0 }
  0x85   :  { %61 = vadd.xlane.f32.xlu1 %v60_v10 }
 0x10a   :  { %v59_v11 = vpop.xlane.xlu1 %58 }
 0x10b   :  { %v64_v12 = vmul.f32 0.03125, %v59_v11 }
 0x10d   :  { %v66_v13 = vsub.f32 %v54_v5, %v64_v12 }
 0x10e   :  { %v62_v14 = vpop.xlane.xlu1 %61 }
 0x10f   :  { %v65_v15 = vmul.f32 0.03125, %v62_v14  ;;  %v68_v16 = vmul.f32 %v66_v13, %v66_v13 }
 0x111   :  { %v67_v17 = vsub.f32 %v55_v9, %v65_v15  ;;  %v70_v18 = vsel %vm56_vm0, %v68_v16, 0.0  ;;  %v500_v9 = vsel %vm496_vm7, %v495_v7, 0.0 }
 0x112   :  { %71 = vadd.xlane.f32.xlu0 %v70_v18 }
 0x113   :  { %v69_v19 = vmul.f32 %v67_v17, %v67_v17 }
 0x115   :  { %v73_v20 = vsel %vm56_vm0, %v69_v19, 0.0 }
 0x116   :  { %74 = vadd.xlane.f32.xlu1 %v73_v20 }
 0x19b   :  { %v72_v22 = vpop.xlane.xlu0 %71 }
 0x19c   :  { %v76_v23 = vmul.f32 0.03125, %v72_v22 }
 0x19e   :  { %v78_v24 = vadd.f32 1e-12, %v76_v23 }
 0x19f   :  { %v75_v25 = vpop.xlane.xlu1 %74 }
 0x1a0   :  { %1203 = vrsqrt.f32 %v78_v24  ;;  %v77_v26 = vmul.f32 0.03125, %v75_v25 }
 0x1a2   :  { %v79_v28 = vadd.f32 1e-12, %v77_v26 }
 0x1a4   :  { %1205 = vrsqrt.f32 %v79_v28 }
 0x1ad   :  { %v1204_v34 = vpop.eup %1203 }
 0x1ae   :  { %v82_v35 = vmul.f32 %v1204_v34, %v66_v13 }
 0x1b0   :  { %v88_v37 = vmul.f32 %v87_v33, %v82_v35 }
 0x1b1   :  { %v1206_v38 = vpop.eup %1205 }
 0x1b2   :  { %v94_v39 = vadd.f32 %v93_v36, %v88_v37  ;;  %v83_v40 = vmul.f32 %v1206_v38, %v67_v17 }
 0x1b4   :  { %1125 = vmatpush3.xpose.msk.msra.mxu0 %vm56_vm0, %v94_v39  ;;  %v89_v42 = vmul.f32 %v87_v33, %v83_v40 }
 0x1b5   :  { %1134 = vmatprep.subr.mxu0 %v1280_v21 }
 0x1b6   :  { %v95_v43 = vadd.f32 %v93_v36, %v89_v42 }
 0x1b7   :  { %1127 = vmatmul.mubr.msk.f32.vlgmr.msra.gmra.mxu0 %vm56_vm0, %v96_v41 }
 0x1b8   :  { %1130 = vmatpush3.xpose.msk.msra.mxu1 %vm56_vm0, %v95_v43  ;;  %1135 = vmatpush3.msra.mxu0 %v94_v39 }
 0x1b9   :  { %1139 = vmatprep.subr.mxu1 %v1280_v21  ;;  %1136 = vmatprep.mubr.msk.f32.mxu0 %vm1281_vm1, %v1280_v21 }
 0x1ba   :  { %1144 = vmatprep.subr.mxu0 %v1280_v21 }
 0x1bb   :  { %1132 = vmatmul.mubr.msk.f32.vlgmr.msra.gmra.mxu1 %vm56_vm0, %v96_v41 }
 0x1bc   :  { %1140 = vmatpush3.msra.mxu1 %v95_v43  ;;  %1141 = vmatprep.mubr.msk.f32.mxu1 %vm1281_vm1, %v1280_v21 }
 0x277   :  { %v169_v49 = vpop.f32.mrf.mxu0 }
 0x278   :  { %v246_v51 = vmul.f32 0.17677669, %v169_v49 }
 0x279   :  { %v1128_v52 = vpop.f32.mrf.mxu0 }
 0x27a   :  { %v264_v53 = vsel %vm262_vm4, %v246_v51, -1e+30  ;;  %v1282_v52 = vmov 1966171168  }
 0x27b   :  { %v242_v54 = vpop.f32.mrf.mxu1  ;;  %v267_v55 = vsel %vm266_vm5, %v264_v53, -inf }
 0x27c   :  { %v247_v56 = vmul.f32 0.17677669, %v242_v54  ;;  %268 = vmax.xlane.f32.xlu1 %v267_v55 }
 0x27d   :  { %v1133_v57 = vpop.f32.mrf.mxu1 }
 0x27e   :  { %v265_v58 = vsel %vm263_vm6, %v247_v56, -1e+30 }
 0x27f   :  { %v270_v59 = vsel %vm266_vm5, %v265_v58, -inf }
 0x280   :  { %271 = vmax.xlane.f32.xlu1 %v270_v59 }
 0x305   :  { %v269_v60 = vpop.xlane.xlu1 %268 }
 0x306   :  { %v273_v61 = vsub.f32 %v264_v53, %v269_v60  ;;  %v526_v53 = vunpack.c.l.s4 %v1282_v52  ;;  %v761_v52 = vld [vmem:[%s1695_s7 + $0xb0] sm:$0xff] }
 0x308   :  { %v275_v62 = vmul.f32 1.442695, %v273_v61  ;;  %v527_v54 = vunpack.c.0.s8 %v526_v53  ;;  %v745_v53 = vld [vmem:[%s1695_s7 + $0x30] sm:$0xff] }
 0x309   :  { %v272_v63 = vpop.xlane.xlu1 %271 }
 0x30a   :  { %1207 = vpow2.f32 %v275_v62  ;;  %v274_v0 = vsub.f32 %v265_v58, %v272_v63  ;;  %v524_v58 = vcombine.high %v1381_v31, %v1381_v31  ;;  %v1434_v59 = vsub.s32 %v527_v54, %v1373_v29  ;;  %v760_v54 = vld [vmem:[%s1695_s7 + $0xa8] sm:$0xff] }
 0x30c   :  { %v277_v1 = vmul.f32 1.442695, %v274_v0  ;;  %v531_v63 = vrot.slane %v524_v58, %v1434_v59  ;;  %v758_v58 = vld [vmem:[%s1695_s7 + $0x98] sm:$0xff] }
 0x30e   :  { %1209 = vpow2.f32 %v277_v1 }
 0x317   :  { %v1208_v2 = vpop.eup %1207 }
 0x318   :  { %v279_v3 = vsel %vm266_vm5, %v1208_v2, 0.0 }
 0x319   :  { %280 = vadd.xlane.f32.xlu1 %v279_v3  ;;  %v542_v3 = vcombine.high %v531_v63, %v531_v63 }
 0x31b   :  { %v1210_v4 = vpop.eup %1209 }
 0x31c   :  { %v282_v5 = vsel %vm266_vm5, %v1210_v4, 0.0 }
 0x31d   :  { %283 = vadd.xlane.f32.xlu1 %v282_v5  ;;  %v465_v5 = vsub.s32 2, %v1373_v29 }
 0x321   :  { %498 = vadd.xlane.f32.xlu1 %v497_v8  ;;  %v549_v8 = vrot.slane %v542_v3, %v1434_v59  ;;  %v734_v3 = vld [vmem:[%s1692_s4 + $0x8] sm:$0xff] }
 0x325   :  { %501 = vadd.xlane.f32.xlu1 %v500_v9 }
 0x3a2   :  { %v281_v10 = vpop.xlane.xlu1 %280 }
 0x3a3   :  { %1211 = vrcp.f32 %v281_v10  ;;  %v1442_v10 = vrot.slane %v1381_v31, %v465_v5  ;;  %v737_v5 = vld [vmem:[%s1692_s4 + $0x20] sm:$0xff] }
 0x3a6   :  { %v284_v11 = vpop.xlane.xlu1 %283 }
 0x3a7   :  { %1213 = vrcp.f32 %v284_v11 }
 0x3aa   :  { %v499_v16 = vpop.xlane.xlu1 %498 }
 0x3ab   :  { %v503_v17 = vmul.f32 0.03125, %v499_v16 }
 0x3ad   :  { %v505_v19 = vsub.f32 %v494_v6, %v503_v17  ;;  %v471_v6 = vsub.s32 3, %v1373_v29 }
 0x3ae   :  { %v502_v18 = vpop.xlane.xlu1 %501 }
 0x3af   :  { %v504_v20 = vmul.f32 0.03125, %v502_v18  ;;  %v507_v23 = vmul.f32 %v505_v19, %v505_v19 }
 0x3b0   :  { %v1212_v12 = vpop.eup %1211 }
 0x3b1   :  { %v286_v13 = vmul.f32 %v1212_v12, %v1208_v2  ;;  %v506_v22 = vsub.f32 %v495_v7, %v504_v20  ;;  %v509_v27 = vsel %vm496_vm7, %v507_v23, 0.0  ;;  %v538_v2 = vrot.slane %v531_v63, %v1434_v59  ;;  %v756_v63 = vld [vmem:[%s1695_s7 + $0x88] sm:$0xff] }
 0x3b3   :  { %1137 = vmatmul.mubr.msk.f32.vlgmr.msra.gmra.mxu0 %vm289_vm8, %v286_v13  ;;  %v508_v28 = vmul.f32 %v506_v22, %v506_v22  ;;  %v1445_v13 = vrot.slane %v1381_v31, %v471_v6  ;;  %v736_v6 = vld [vmem:[%s1692_s4 + $0x18] sm:$0xff] }
 0x3b4   :  { %v1214_v14 = vpop.eup %1213  ;;  %1152 = vmatprep.mubr.msk.f32.mxu0 %vm1281_vm1, %v1280_v21 }
 0x3b5   :  { %v288_v15 = vmul.f32 %v1214_v14, %v1210_v4  ;;  %v512_v35 = vsel %vm496_vm7, %v508_v28, 0.0  ;;  %v770_v28 = vld [vmem:[%s1695_s7 + $0xf8] sm:$0xff] }
 0x3b6   :  { %1068 = vmatprep.subr.mxu1 %v770_v28 }
 0x3b7   :  { %1142 = vmatmul.mubr.msk.f32.vlgmr.msra.gmra.mxu1 %vm289_vm8, %v288_v15 }
 0x3b8   :  { %858 = vmatprep.mubr.f32.mxu1 %v734_v3 }
 0x473   :  { %v359_v24 = vpop.f32.mrf.mxu0 }
 0x474   :  { %v437_v25 = vsel %vm436_vm9, %v359_v24, 0.0 }
 0x475   :  { %438 = vadd.xlane.f32.xlu1 %v437_v25  ;;  %v1138_v26 = vpop.f32.mrf.mxu0 }
 0x477   :  { %v432_v32 = vpop.f32.mrf.mxu1 }
 0x478   :  { %v440_v33 = vsel %vm436_vm9, %v432_v32, 0.0 }
 0x479   :  { %441 = vadd.xlane.f32.xlu0 %v440_v33  ;;  %v1143_v34 = vpop.f32.mrf.mxu1  ;;  %510 = vadd.xlane.f32.xlu1 %v509_v27  ;;  %v631_v33 = vld [vmem:[%s1694_s6 + $0x18] sm:$0xff] }
 0x47a   :  { %v753_v34 = vld [vmem:[%s1695_s7 + $0x70] sm:$0xff]  ;;  %1145 = vmatpush3.msra.mxu0 %v631_v33 }
 0x47b   :  { %1146 = vmatprep.subr.mxu0 %v1280_v21 }
 0x47d   :  { %513 = vadd.xlane.f32.xlu0 %v512_v35  ;;  %v768_v35 = vld [vmem:[%s1695_s7 + $0xe8] sm:$0xff] }
 0x4fe   :  { %v439_v36 = vpop.xlane.xlu1 %438 }
 0x4ff   :  { %v443_v37 = vmul.f32 0.03125, %v439_v36  ;;  %v630_v36 = vld [vmem:[%s1694_s6 + $0x10] sm:$0xff] }
 0x500   :  { %1147 = vmatpush3.msra.mxu0 %v630_v36 }
 0x501   :  { %v445_v38 = vsub.f32 %v359_v24, %v443_v37  ;;  %v752_v37 = vld [vmem:[%s1695_s7 + $0x68] sm:$0xff]  ;;  %1148 = vmatprep.subr.mxu0 %v1280_v21 }
 0x502   :  { %v442_v39 = vpop.xlane.xlu0 %441  ;;  %v511_v46 = vpop.xlane.xlu1 %510 }
 0x503   :  { %v444_v40 = vmul.f32 0.03125, %v442_v39  ;;  %v447_v41 = vmul.f32 %v445_v38, %v445_v38  ;;  %v515_v47 = vmul.f32 0.03125, %v511_v46  ;;  %v767_v39 = vld [vmem:[%s1695_s7 + $0xe0] sm:$0xff]  ;;  %v749_v46 = vld [vmem:[%s1695_s7 + $0x50] sm:$0xff] }
 0x505   :  { %v446_v42 = vsub.f32 %v432_v32, %v444_v40  ;;  %v449_v43 = vsel %vm436_vm9, %v447_v41, 0.0  ;;  %v517_v49 = vadd.f32 1e-05, %v515_v47  ;;  %v754_v32 = vld [vmem:[%s1695_s7 + $0x78] sm:$0xff]  ;;  %v751_v40 = vld [vmem:[%s1695_s7 + $0x60] sm:$0xff]  ;;  %v748_v47 = vld [vmem:[%s1695_s7 + $0x48] sm:$0xff] }
 0x506   :  { %450 = vadd.xlane.f32.xlu1 %v449_v43  ;;  %v514_v48 = vpop.xlane.xlu0 %513  ;;  %1069 = vmatpush3.msra.mxu1 %v754_v32  ;;  %v628_v41 = vld [vmem:[%s1694_s6] sm:$0xff]  ;;  %v1509_v43 = vld [vmem:[%s1695_s7 + $0x178] sm:$0xff] }
 0x507   :  { %v448_v44 = vmul.f32 %v446_v42, %v446_v42  ;;  %v516_v50 = vmul.f32 0.03125, %v514_v48  ;;  %1215 = vrsqrt.f32 %v517_v49  ;;  %v763_v48 = vld [vmem:[%s1695_s7 + $0xc0] sm:$0xff] }
 0x508   :  { %v747_v49 = vld [vmem:[%s1695_s7 + $0x40] sm:$0xff] }
 0x509   :  { %v452_v45 = vsel %vm436_vm9, %v448_v44, 0.0  ;;  %v518_v51 = vadd.f32 1e-05, %v516_v50  ;;  %v750_v44 = vld [vmem:[%s1695_s7 + $0x58] sm:$0xff] }
 0x50a   :  { %453 = vadd.xlane.f32.xlu0 %v452_v45  ;;  %v765_v45 = vld [vmem:[%s1695_s7 + $0xd0] sm:$0xff]  ;;  %v762_v50 = vld [vmem:[%s1695_s7 + $0xb8] sm:$0xff] }
 0x50b   :  { %1217 = vrsqrt.f32 %v518_v51  ;;  %v746_v51 = vld [vmem:[%s1695_s7 + $0x38] sm:$0xff] }
 0x514   :  { %v1216_v0 = vpop.eup %1215 }
 0x515   :  { %v521_v1 = vmul.f32 %v1216_v0, %v505_v19  ;;  %v740_v0 = vld [vmem:[%s1695_s7 + $0x8] sm:$0xff] }
 0x517   :  { %v540_v7 = vmul.f32 %v538_v2, %v521_v1  ;;  %v755_v1 = vld [vmem:[%s1695_s7 + $0x80] sm:$0xff] }
 0x518   :  { %v1218_v4 = vpop.eup %1217 }
 0x519   :  { %v522_v9 = vmul.f32 %v1218_v4, %v506_v22  ;;  %v551_v14 = vadd.f32 %v549_v8, %v540_v7  ;;  %v733_v4 = vld [vmem:[%s1692_s4] sm:$0xff] }
 0x51b   :  { %v541_v15 = vmul.f32 %v538_v2, %v522_v9  ;;  %v558_v29 = vrot.slane %v551_v14, %v1376_v30  ;;  %v739_v2 = vld [vmem:[%s1695_s7] sm:$0xff] }
 0x51d   :  { %v552_v20 = vadd.f32 %v549_v8, %v541_v15 }
 0x51f   :  { %v562_v25 = vrot.slane %v552_v20, %v1376_v30  ;;  %v769_v30 = vld [vmem:[%s1695_s7 + $0xf0] sm:$0xff] }
 0x520   :  { %1070 = vmatprep.subr.mxu1 %v769_v30 }
 0x521   :  { %1071 = vmatpush3.msra.mxu1 %v753_v34 }
 0x522   :  { %1072 = vmatprep.subr.mxu1 %v768_v35 }
 0x523   :  { %1073 = vmatpush3.msra.mxu1 %v752_v37 }
 0x524   :  { %1074 = vmatprep.subr.mxu1 %v767_v39 }
 0x525   :  { %1075 = vmatpush3.msra.mxu1 %v751_v40 }
 0x58f   :  { %v451_v55 = vpop.xlane.xlu1 %450 }
 0x590   :  { %v455_v56 = vmul.f32 0.03125, %v451_v55  ;;  %v744_v55 = vld [vmem:[%s1695_s7 + $0x28] sm:$0xff] }
 0x592   :  { %v457_v57 = vadd.f32 1e-05, %v455_v56  ;;  %v759_v56 = vld [vmem:[%s1695_s7 + $0xa0] sm:$0xff] }
 0x593   :  { %v454_v60 = vpop.xlane.xlu0 %453 }
 0x594   :  { %1219 = vrsqrt.f32 %v457_v57  ;;  %v456_v61 = vmul.f32 0.03125, %v454_v60  ;;  %v743_v57 = vld [vmem:[%s1695_s7 + $0x20] sm:$0xff]  ;;  %v742_v60 = vld [vmem:[%s1695_s7 + $0x18] sm:$0xff] }
 0x596   :  { %v458_v62 = vadd.f32 1e-05, %v456_v61  ;;  %v757_v61 = vld [vmem:[%s1695_s7 + $0x90] sm:$0xff] }
 0x598   :  { %1221 = vrsqrt.f32 %v458_v62  ;;  %v741_v62 = vld [vmem:[%s1695_s7 + $0x10] sm:$0xff] }
 0x5a1   :  { %v1220_v11 = vpop.eup %1219 }
 0x5a2   :  { %v461_v12 = vmul.f32 %v1220_v11, %v445_v38  ;;  %v629_v38 = vld [vmem:[%s1694_s6 + $0x8] sm:$0xff] }
 0x5a3   :  { %1149 = vmatpush3.msra.mxu0 %v629_v38 }
 0x5a4   :  { %v467_v16 = vmul.f32 %v1442_v10, %v461_v12  ;;  %1150 = vmatprep.subr.mxu0 %v1280_v21  ;;  %v764_v21 = vld [vmem:[%s1695_s7 + $0xc8] sm:$0xff] }
 0x5a5   :  { %v1222_v17 = vpop.eup %1221  ;;  %1151 = vmatpush3.msra.mxu0 %v628_v41 }
 0x5a6   :  { %v1449_v18 = vadd.f32 %v1445_v13, %v467_v16  ;;  %v462_v19 = vmul.f32 %v1222_v17, %v446_v42  ;;  %v766_v42 = vld [vmem:[%s1695_s7 + $0xd8] sm:$0xff]  ;;  %1155 = vmatprep.subr.mxu0 %v1509_v43 }
 0x5a7   :  { %1076 = vmatprep.subr.mxu1 %v766_v42 }
 0x5a8   :  { %v565_v22 = vmul.f32 %v558_v29, %v1449_v18  ;;  %475 = vst.msk [vmem:[#allocation2] sm:$0xf] %vm436_vm9, %v1449_v18  ;;  %v468_v31 = vmul.f32 %v1442_v10, %v462_v19  ;;  %1077 = vmatpush3.msra.mxu1 %v750_v44 }
 0x5a9   :  { %1078 = vmatprep.subr.mxu1 %v765_v45 }
 0x5aa   :  { %v567_v23 = vsel %vm436_vm9, %v565_v22, 0.0  ;;  %v1458_v24 = vadd.f32 %v1445_v13, %v468_v31  ;;  %1079 = vmatpush3.msra.mxu1 %v749_v46 }
 0x5ab   :  { %568 = vadd.xlane.f32.xlu1 %v567_v23  ;;  %1080 = vmatprep.subr.mxu1 %v764_v21 }
 0x5ac   :  { %v566_v26 = vmul.f32 %v562_v25, %v1458_v24  ;;  %476 = vst.msk [vmem:[#allocation2 + $0x4] sm:$0xf] %vm436_vm9, %v1458_v24  ;;  %1081 = vmatpush3.msra.mxu1 %v748_v47 }
 0x5ad   :  { %1082 = vmatprep.subr.mxu1 %v763_v48 }
 0x5ae   :  { %v570_v27 = vsel %vm436_vm9, %v566_v26, 0.0  ;;  %1083 = vmatpush3.msra.mxu1 %v747_v49 }
 0x5af   :  { %571 = vadd.xlane.f32.xlu0 %v570_v27  ;;  %1084 = vmatprep.subr.mxu1 %v762_v50 }
 0x5b0   :  { %1085 = vmatpush3.msra.mxu1 %v746_v51 }
 0x5b1   :  { %1086 = vmatprep.subr.mxu1 %v761_v52 }
 0x5b2   :  { %1087 = vmatpush3.msra.mxu1 %v745_v53 }
 0x5b3   :  { %1088 = vmatprep.subr.mxu1 %v760_v54 }
 0x5b4   :  { %1089 = vmatpush3.msra.mxu1 %v744_v55 }
 0x5b5   :  { %1090 = vmatprep.subr.mxu1 %v759_v56 }
 0x5b6   :  { %1091 = vmatpush3.msra.mxu1 %v743_v57 }
 0x5b7   :  { %1092 = vmatprep.subr.mxu1 %v758_v58 }
 0x5b8   :  { %1093 = vmatpush3.msra.mxu1 %v742_v60 }
 0x5b9   :  { %1094 = vmatprep.subr.mxu1 %v757_v61 }
 0x5ba   :  { %1095 = vmatpush3.msra.mxu1 %v741_v62 }
 0x5bb   :  { %1096 = vmatprep.subr.mxu1 %v756_v63 }
 0x5bc   :  { %1097 = vmatpush3.msra.mxu1 %v740_v0 }
 0x5bd   :  { %1098 = vmatprep.subr.mxu1 %v755_v1 }
 0x5be   :  { %1099 = vmatpush3.msra.mxu1 %v739_v2 }
 0x5bf   :  { %859 = vmatmul.mubr.f32.vlgmr.msra.gmra.mxu1 %v733_v4 }
 0x5c0   :  { %863 = vmatprep.mubr.f32.mxu1 %v737_v5  ;;  %v735_v5 = vld [vmem:[%s1692_s4 + $0x10] sm:$0xff] }
 0x5c3   :  { %864 = vmatmul.mubr.f32.gmra.mxu1 %v736_v6 }
 0x634   :  { %v569_v7 = vpop.xlane.xlu1 %568 }
 0x635   :  { %v574_v8 = vsel %vm573_vm10, %v569_v7, -inf }
 0x636   :  { %v575_v9 = vrot.slane %v574_v8, 4 }
 0x638   :  { %v576_v11 = vmax.f32 %v574_v8, %v575_v9  ;;  %v572_v12 = vpop.xlane.xlu0 %571  ;;  %v784_v8 = vld [vmem:[%s1695_s7 + $0x168] sm:$0xff]  ;;  %v783_v9 = vld [vmem:[%s1695_s7 + $0x160] sm:$0xff] }
 0x639   :  { %v581_v14 = vsel %vm573_vm10, %v572_v12, -inf }
 0x63a   :  { %v577_v15 = vrot.slane %v576_v11, 2  ;;  %v582_v16 = vrot.slane %v581_v14, 4 }
 0x63c   :  { %v578_v17 = vmax.f32 %v576_v11, %v577_v15  ;;  %v583_v29 = vmax.f32 %v581_v14, %v582_v16  ;;  %v782_v11 = vld [vmem:[%s1695_s7 + $0x158] sm:$0xff]  ;;  %v779_v14 = vld [vmem:[%s1695_s7 + $0x140] sm:$0xff]  ;;  %v777_v16 = vld [vmem:[%s1695_s7 + $0x130] sm:$0xff] }
 0x63d   :  { %v778_v15 = vld [vmem:[%s1695_s7 + $0x138] sm:$0xff] }
 0x63e   :  { %v579_v19 = vrot.slane %v578_v17, 1  ;;  %v584_v20 = vrot.slane %v583_v29, 2 }
 0x640   :  { %v580_v22 = vmax.f32 %v578_v17, %v579_v19  ;;  %v585_v31 = vmax.f32 %v583_v29, %v584_v20  ;;  %v776_v17 = vld [vmem:[%s1695_s7 + $0x128] sm:$0xff]  ;;  %v775_v29 = vld [vmem:[%s1695_s7 + $0x120] sm:$0xff]  ;;  %v774_v19 = vld [vmem:[%s1695_s7 + $0x118] sm:$0xff] }
 0x641   :  { %v773_v20 = vld [vmem:[%s1695_s7 + $0x110] sm:$0xff] }
 0x642   :  { %v588_v23 = vsub.f32 %v569_v7, %v580_v22  ;;  %v586_v25 = vrot.slane %v585_v31, 1  ;;  %v785_v7 = vld [vmem:[%s1695_s7 + $0x170] sm:$0xff]  ;;  %v772_v22 = vld [vmem:[%s1695_s7 + $0x108] sm:$0xff] }
 0x644   :  { %v590_v26 = vmul.f32 1.442695, %v588_v23  ;;  %v587_v27 = vmax.f32 %v585_v31, %v586_v25  ;;  %v771_v31 = vld [vmem:[%s1695_s7 + $0x100] sm:$0xff]  ;;  %v738_v23 = vld [vmem:[%s1692_s4 + $0x28] sm:$0xff]  ;;  %s1283_s4 = smov 64  }
 0x646   :  { %1223 = vpow2.f32 %v590_v26  ;;  %v589_v28 = vsub.f32 %v572_v12, %v587_v27  ;;  %v780_v12 = vld [vmem:[%s1695_s7 + $0x148] sm:$0xff] }
 0x648   :  { %v592_v32 = vmul.f32 1.442695, %v589_v28 }
 0x64a   :  { %1225 = vpow2.f32 %v592_v32 }
 0x653   :  { %v1224_v30 = vpop.eup %1223 }
 0x654   :  { %v594_v33 = vsel %vm573_vm10, %v1224_v30, 0.0 }
 0x655   :  { %v595_v34 = vrot.slane %v594_v33, 4 }
 0x657   :  { %v1226_v35 = vpop.eup %1225  ;;  %v596_v36 = vadd.f32 %v595_v34, %v594_v33  ;;  %v1054_v34 = vld [vmem:[%s1696_s8] ss:$0 sm:$0xff] }
 0x658   :  { %v601_v37 = vsel %vm573_vm10, %v1226_v35, 0.0 }
 0x659   :  { %v597_v38 = vrot.slane %v596_v36, 2  ;;  %v602_v39 = vrot.slane %v601_v37, 4 }
 0x65b   :  { %v598_v40 = vadd.f32 %v597_v38, %v596_v36  ;;  %v603_v41 = vadd.f32 %v602_v39, %v601_v37 }
 0x65d   :  { %v599_v42 = vrot.slane %v598_v40, 1  ;;  %v604_v44 = vrot.slane %v603_v41, 2 }
 0x65f   :  { %v600_v45 = vadd.f32 %v599_v42, %v598_v40  ;;  %v605_v46 = vadd.f32 %v604_v44, %v603_v41 }
 0x661   :  { %1227 = vrcp.f32 %v600_v45  ;;  %v606_v21 = vrot.slane %v605_v46, 1  ;;  %v477_v45 = vsel %vm436_vm9, %v1449_v18, 0.0 }
 0x663   :  { %v607_v47 = vadd.f32 %v606_v21, %v605_v46 }
 0x665   :  { %1229 = vrcp.f32 %v607_v47  ;;  %v478_v47 = vrot.slane %v477_v45, 4 }
 0x66e   :  { %v1228_v48 = vpop.eup %1227 }
 0x66f   :  { %v609_v49 = vmul.f32 %v1228_v48, %v1224_v30  ;;  %v484_v48 = vsel %vm436_vm9, %v1458_v24, 0.0 }
 0x671   :  { %v612_v50 = vmul.f32 %v609_v49, %v1449_v18 }
 0x672   :  { %v1230_v51 = vpop.eup %1229 }
 0x673   :  { %v611_v52 = vmul.f32 %v1230_v51, %v1226_v35  ;;  %v614_v53 = vsel %vm436_vm9, %v612_v50, 0.0 }
 0x674   :  { %v615_v54 = vrot.slane %v614_v53, 4 }
 0x675   :  { %v613_v55 = vmul.f32 %v611_v52, %v1458_v24  ;;  %v485_v52 = vrot.slane %v484_v48, 4 }
 0x676   :  { %v616_v56 = vadd.f32 %v615_v54, %v614_v53 }
 0x677   :  { %v621_v57 = vsel %vm436_vm9, %v613_v55, 0.0  ;;  %v479_v55 = vadd.f32 %v478_v47, %v477_v45 }
 0x678   :  { %v617_v58 = vrot.slane %v616_v56, 2  ;;  %v622_v60 = vrot.slane %v621_v57, 4 }
 0x67a   :  { %v618_v61 = vadd.f32 %v617_v58, %v616_v56  ;;  %v623_v62 = vadd.f32 %v622_v60, %v621_v57  ;;  %v486_v58 = vadd.f32 %v485_v52, %v484_v48  ;;  %v480_v60 = vrot.slane %v479_v55, 2 }
 0x67c   :  { %v624_v63 = vrot.slane %v623_v62, 2  ;;  %v619_v0 = vrot.slane %v618_v61, 1 }
 0x67e   :  { %v625_v1 = vadd.f32 %v624_v63, %v623_v62  ;;  %v620_v3 = vadd.f32 %v619_v0, %v618_v61  ;;  %v487_v61 = vrot.slane %v486_v58, 2  ;;  %v481_v62 = vadd.f32 %v480_v60, %v479_v55 }
 0x67f   :  { %v1100_v27 = vpop.f32.mrf.mxu1 }
 0x680   :  { %v626_v2 = vrot.slane %v625_v1, 1  ;;  %v488_v63 = vadd.f32 %v487_v61, %v486_v58  ;;  %v482_v24 = vrot.slane %v481_v62, 1 }
 0x681   :  { %v1101_v28 = vpop.f32.mrf.mxu1 }
 0x682   :  { %v627_v4 = vadd.f32 %v626_v2, %v625_v1  ;;  %v1102_v35 = vadd.f32 %v1101_v28, %v1100_v27  ;;  %v489_v0 = vrot.slane %v488_v63, 1  ;;  %v483_v1 = vadd.f32 %v482_v24, %v481_v62 }
 0x683   :  { %v1103_v32 = vpop.f32.mrf.mxu1 }
 0x684   :  { %v635_v6 = vsel %vm634_vm11, %v627_v4, %v620_v3  ;;  %v861_v39 = vadd.f32 %v1102_v35, %v1054_v34  ;;  %v490_v2 = vadd.f32 %v489_v0, %v488_v63  ;;  %v492_v3 = vmul.f32 0.25, %v483_v1 }
 0x685   :  { %1153 = vmatmul.mubr.msk.f32.vlgmr.msra.gmra.mxu0 %vm56_vm0, %v635_v6  ;;  %v1104_v30 = vpop.f32.mrf.mxu1 }
 0x686   :  { %1156 = vmatpush3.msra.mxu0 %v1509_v43  ;;  %1187 = vmatprep.mubr.f32.mxu0 %v735_v5  ;;  %v781_v43 = vld [vmem:[%s1695_s7 + $0x150] sm:$0xff]  ;;  %v1105_v33 = vadd.f32 %v1104_v30, %v1103_v32  ;;  %v493_v4 = vmul.f32 0.25, %v490_v2  ;;  %s1284_s7 = smov [#allocation2]  }
 0x687   :  { %1157 = vmatprep.subr.mxu0 %v785_v7  ;;  %s1020_s8 = sshll.u32 %s1284_s7, 4  ;;  %s1021_s8 = int_to_ptr.vmem [resolvable:$true] %s1020_s8 }
 0x688   :  { %1158 = vmatpush3.msra.mxu0 %v785_v7  ;;  %v866_v36 = vadd.f32 %v1105_v33, %v1054_v34  ;;  %s1235_s1 = scalar_lea.vmem %s1021_s8, 128  ;;  %p1240_p1 = scmp.lt.s32.totalorder %s1021_s8, %s1021_s8 }
 0x689   :  { %1159 = vmatprep.subr.mxu0 %v784_v8  ;;  %p1236_p0 = scmp.ne.s32.totalorder %s1021_s8, %s1235_s1  ;;  %p1241_p2 = scmp.lt.s32.totalorder %s1235_s1, %s1235_s1 }
 0x68a   :  { %1160 = vmatpush3.msra.mxu0 %v784_v8 }
 0x68b   :  { %1161 = vmatprep.subr.mxu0 %v783_v9  ;;  %p1242_p3 = por %p1241_p2, %p1240_p1 }
 0x68c   :  { %1162 = vmatpush3.msra.mxu0 %v783_v9 }
 0x68d   :  { %1163 = vmatprep.subr.mxu0 %v782_v11  ;;  %p1243_p4 = pnand %p1242_p3, %p1236_p0 }
 0x68e   :  { %1164 = vmatpush3.msra.mxu0 %v782_v11 }
 0x68f   :  { %1165 = vmatprep.subr.mxu0 %v781_v43 }
 0x690   :  { %1166 = vmatpush3.msra.mxu0 %v781_v43 }
 0x691   :  { %1167 = vmatprep.subr.mxu0 %v780_v12 }
 0x692   :  { %1168 = vmatpush3.msra.mxu0 %v780_v12 }
 0x693   :  { %1169 = vmatprep.subr.mxu0 %v779_v14 }
 0x694   :  { %1170 = vmatpush3.msra.mxu0 %v779_v14 }
 0x695   :  { %1171 = vmatprep.subr.mxu0 %v778_v15 }
 0x696   :  { %1172 = vmatpush3.msra.mxu0 %v778_v15 }
 0x697   :  { %1173 = vmatprep.subr.mxu0 %v777_v16 }
 0x698   :  { %1174 = vmatpush3.msra.mxu0 %v777_v16 }
 0x699   :  { %1175 = vmatprep.subr.mxu0 %v776_v17 }
 0x69a   :  { %1176 = vmatpush3.msra.mxu0 %v776_v17 }
 0x69b   :  { %1177 = vmatprep.subr.mxu0 %v775_v29 }
 0x69c   :  { %1178 = vmatpush3.msra.mxu0 %v775_v29 }
 0x69d   :  { %1179 = vmatprep.subr.mxu0 %v774_v19 }
 0x69e   :  { %1180 = vmatpush3.msra.mxu0 %v774_v19 }
 0x69f   :  { %1181 = vmatprep.subr.mxu0 %v773_v20 }
 0x6a0   :  { %1182 = vmatpush3.msra.mxu0 %v773_v20 }
 0x6a1   :  { %1183 = vmatprep.subr.mxu0 %v772_v22 }
 0x6a2   :  { %1184 = vmatpush3.msra.mxu0 %v772_v22 }
 0x6a3   :  { %1185 = vmatprep.subr.mxu0 %v771_v31 }
 0x6a4   :  { %1186 = vmatpush3.msra.mxu0 %v771_v31 }
 0x6a5   :  { %1188 = vmatmul.mubr.f32.vlgmr.msra.gmra.mxu0 %v738_v23 }
 0x745   :  { %v1655_v25 = vpop.f32.mrf.mxu0 }
 0x747   :  { %v1154_v26 = vpop.f32.mrf.mxu0 }
 0x765   :  { %v1189_v37 = vpop.f32.mrf.mxu0 }
 0x766   :  { %v941_v38 = vadd.f32 %v1189_v37, %v866_v36 }
 0x767   :  { %v935_v40 = vpop.f32.mrf.mxu0 }
 0x768   :  { %v936_v41 = vadd.f32 %v935_v40, %v861_v39  ;;  %v947_v42 = vsel %vm56_vm0, %v941_v38, 0.0 }
 0x769   :  { %948 = vadd.xlane.f32.xlu0 %v947_v42 }
 0x76a   :  { %v944_v44 = vsel %vm56_vm0, %v936_v41, 0.0 }
 0x76b   :  { %945 = vadd.xlane.f32.xlu1 %v944_v44 }
 0x7f2   :  { %v949_v46 = vpop.xlane.xlu0 %948 }
 0x7f3   :  { %v951_v21 = vmul.f32 0.03125, %v949_v46 }
 0x7f4   :  { %v946_v49 = vpop.xlane.xlu1 %945 }
 0x7f5   :  { %v953_v50 = vsub.f32 %v941_v38, %v951_v21  ;;  %v950_v51 = vmul.f32 0.03125, %v946_v49 }
 0x7f7   :  { %v952_v53 = vsub.f32 %v936_v41, %v950_v51  ;;  %v955_v54 = vmul.f32 %v953_v50, %v953_v50 }
 0x7f9   :  { %v959_v56 = vsel %vm56_vm0, %v955_v54, 0.0  ;;  %v954_v57 = vmul.f32 %v952_v53, %v952_v53 }
 0x7fa   :  { %960 = vadd.xlane.f32.xlu0 %v959_v56 }
 0x7fb   :  { %v956_v18 = vsel %vm56_vm0, %v954_v57, 0.0 }
 0x7fc   :  { %957 = vadd.xlane.f32.xlu1 %v956_v18 }
 0x80d   :  { %993 = vrot.lane.b32.xlu1 %v492_v3, %s1283_s4 }
 0x810   :  { %995 = vrot.lane.b32.xlu0 %v493_v4, %s1283_s4 }
 0x883   :  { %v961_v5 = vpop.xlane.xlu0 %960 }
 0x884   :  { %v963_v6 = vmul.f32 0.03125, %v961_v5 }
 0x885   :  { %v958_v7 = vpop.xlane.xlu1 %957 }
 0x886   :  { %v965_v8 = vadd.f32 1e-05, %v963_v6  ;;  %v962_v9 = vmul.f32 0.03125, %v958_v7 }
 0x888   :  { %1231 = vrsqrt.f32 %v965_v8  ;;  %v964_v11 = vadd.f32 1e-05, %v962_v9 }
 0x88a   :  { %1233 = vrsqrt.f32 %v964_v11 }
 0x895   :  { %v1232_v43 = vpop.eup %1231 }
 0x896   :  { %v969_v12 = vmul.f32 %v1232_v43, %v953_v50 }
 0x897   :  { %v1234_v14 = vpop.eup %1233 }
 0x898   :  { %v968_v15 = vmul.f32 %v1234_v14, %v952_v53  ;;  %v971_v16 = vmul.f32 %v969_v12, %v1442_v10 }
 0x89a   :  { %v970_v17 = vmul.f32 %v968_v15, %v1442_v10  ;;  %v973_v29 = vadd.f32 %v971_v16, %v1445_v13 }
 0x89c   :  { %v972_v19 = vadd.f32 %v970_v17, %v1445_v13  ;;  %v981_v20 = vsel %vm56_vm0, %v973_v29, 0.0 }
 0x89d   :  { %v982_v22 = vrot.slane %v981_v20, 4 }
 0x89e   :  { %v974_v31 = vsel %vm56_vm0, %v972_v19, 0.0 }
 0x89f   :  { %v975_v23 = vrot.slane %v974_v31, 4  ;;  %v983_v26 = vadd.f32 %v982_v22, %v981_v20 }
 0x8a1   :  { %v976_v27 = vadd.f32 %v975_v23, %v974_v31  ;;  %v984_v28 = vrot.slane %v983_v26, 2 }
 0x8a3   :  { %v977_v32 = vrot.slane %v976_v27, 2  ;;  %v985_v30 = vadd.f32 %v984_v28, %v983_v26 }
 0x8a5   :  { %v978_v33 = vadd.f32 %v977_v32, %v976_v27 }
 0x8a6   :  { %1246 = shalt.err (!%p1243_p4)
}
 0x8a7   :  { %s1285_s25 = smov 4   ;;  %v979_v10 = vrot.slane %v978_v33, 1  ;;  %v986_v13 = vrot.slane %v985_v30, 1  ;;  %s1286_s9 = smov 96   ;;  %v715_v38 = vrot.slane %v1655_v25, %v1434_v59  ;;  %v994_v39 = vpop.permute.xlu1 %993  ;;  %vm1010_vm12 = vcmask 785408   ;;  %v996_v45 = vpop.permute.xlu0 %995 }
 0x8a8   :  { %1026 = dma.vmem_to_hbm [thread:$0]  %s1021_s8, 128, %s1698_s10, [#allocation3], %s1283_s4, %s1283_s4, %s1285_s25   ;;  %vm1007_vm13 = vcmask 523264  }
 0x8a9   :  { %v980_v34 = vadd.f32 %v979_v10, %v978_v33  ;;  %v987_v36 = vadd.f32 %v986_v13, %v985_v30  ;;  %v716_v40 = vcombine.high %v715_v38, %v715_v38  ;;  %v723_v41 = vrot.slane %v715_v38, %v1434_v59  ;;  %s1287_s10 = smov [#allocation4]  }
 0x8aa   :  { %s1032_s27 = sshll.u32 %s1287_s10, 4  ;;  %s1033_s27 = int_to_ptr.vmem [resolvable:$true] %s1032_s27 }
 0x8ab   :  { %v989_v35 = vmul.f32 0.125, %v980_v34  ;;  %v990_v37 = vmul.f32 0.125, %v987_v36  ;;  %v1008_v42 = vsel %vm1007_vm13, %v723_v41, %v994_v39  ;;  %v730_v21 = vrot.slane %v716_v40, %v1434_v59  ;;  %s1255_s28 = scalar_lea.vmem %s1033_s27, 32  ;;  %p1260_p6 = scmp.lt.s32.totalorder %s1033_s27, %s1033_s27 }
 0x8ac   :  { %p1256_p5 = scmp.ne.s32.totalorder %s1033_s27, %s1255_s28  ;;  %p1261_p7 = scmp.lt.s32.totalorder %s1255_s28, %s1255_s28 }
 0x8ad   :  { %1001 = vrot.lane.b32.xlu1 %v989_v35, %s1286_s9  ;;  %v1009_v47 = vsel %vm1007_vm13, %v730_v21, %v996_v45 }
 0x8ae   :  { %p1262_p8 = por %p1261_p7, %p1260_p6 }
 0x8b0   :  { %p1263_p9 = pnand %p1262_p8, %p1256_p5 }
 0x8b1   :  { %1003 = vrot.lane.b32.xlu1 %v990_v37, %s1286_s9 }
 0x91f   :  { %v1002_v44 = vpop.permute.xlu1 %1001 }
 0x920   :  { %v1011_v46 = vsel %vm1010_vm12, %v1008_v42, %v1002_v44 }
 0x921   :  { %1013 = vst [vmem:[#allocation4] sm:$0x1] %v1011_v46 }
 0x923   :  { %v1004_v48 = vpop.permute.xlu1 %1003 }
 0x924   :  { %v1012_v49 = vsel %vm1010_vm12, %v1009_v47, %v1004_v48 }
 0x925   :  { %1014 = vst [vmem:[#allocation4 + $0x1] sm:$0x1] %v1012_v49 }
 0x926   :  { %1266 = shalt.err (!%p1263_p9)
}
 0x927   :  { %s1288_s2 = smov 16   ;;  %s1289_s29 = smov 1  }
 0x928   :  { %1038 = dma.vmem_to_hbm [thread:$0]  %s1033_s27, 32, %s1699_s11, [#allocation5], %s1288_s2, %s1288_s2, %s1289_s29  }
 0x929   :  { %1275 = dma.done.wait [#allocation3], 128  }
 0x92a   :  { %1276 = vsyncadd [#allocation3], 4294967168 }
 0x92b   :  { %1277 = dma.done.wait [#allocation5], 32  }
 0x92c   :  { %1278 = vsyncadd [#allocation5], 4294967264 }
 0x92d   :  { %1045 = vsyncpa [#allocation3], 1 }
 0x92e   :  { %1046 = vsyncpa [#allocation5], 1 }

</bundles_post_ra>
